<compile_context>
chip_gen: v7x
topology: tpu7x:2x2x1
jax: 0.10.0
libtpu: 0.0.40
codegen_flags: <defaults>
</compile_context>

<pallas_src>
import functools

import jax
import jax.numpy as jnp
from jax.experimental import pallas as pl
from jax.experimental.pallas import tpu as pltpu

hidden_size = 4
input_size = 2
output_size = 2

# Offsets into the packed parameter vector (f32, length 22).
W1_OFF = 0
B1_OFF = W1_OFF + hidden_size * input_size          # 8
W2_OFF = B1_OFF + hidden_size                        # 12
B2_OFF = W2_OFF + output_size * hidden_size          # 20
N_PARAMS = B2_OFF + output_size                      # 22


def mlp_kernel(params_ref, x_ref, o_ref):
    # params_ref: SMEM f32[N_PARAMS]  (w1 row-major, b1, w2 row-major, b2)
    # x_ref     : VMEM (input_size,  S, 128)  -- each feature plane is a dense slab
    # o_ref     : VMEM (output_size, S, 128)
    xs = [x_ref[i] for i in range(input_size)]       # input feature planes (S, 128)

    # Layer 1 + sigmoid: unrolled scalar-splat FMAs on the VPU, tanh on the EUP.
    hid = []
    for h in range(hidden_size):
        pre = xs[0] * params_ref[W1_OFF + h * input_size]
        for i in range(1, input_size):
            pre = pre + xs[i] * params_ref[W1_OFF + h * input_size + i]
        pre = pre + params_ref[B1_OFF + h]
        hid.append(0.5 * (jnp.tanh(0.5 * pre) + 1.0))   # sigmoid, single EUP op

    # Layer 2: out[o] = b2[o] + sum_h w2[o,h] * hid[h]
    for o in range(output_size):
        acc = hid[0] * params_ref[W2_OFF + o * hidden_size]
        for h in range(1, hidden_size):
            acc = acc + hid[h] * params_ref[W2_OFF + o * hidden_size + h]
        acc = acc + params_ref[B2_OFF + o]
        o_ref[o] = acc.astype(o_ref.dtype)             # lane- and sublane-dense store


@functools.partial(jax.jit, static_argnames=("block_rows",))
def mlp_forward(x, w1, b1, w2, b2, *, block_rows=2048):
    """x: (B, input_size). PyTorch layout: W (out, in), b (out,). Returns (B, output_size)."""
    B = x.shape[0]
    dtype = x.dtype
    lanes = 128

    # Fold batch into 128-wide columns; round the column count up to sublane groups of 8.
    rows = pl.cdiv(B, lanes)                  # number of 128-wide batch columns
    rows8 = pl.cdiv(rows, 8) * 8

    # Block size in columns (multiple of 8). 2048 -> 2 MiB per streamed f32 block.
    S = int(min(block_rows, rows8))
    # If the whole batch would fit in one block but spans >=2 sublane groups, split it
    # so the grid has >=2 steps (megacore sharding + DMA prefetch/writeback overlap).
    if rows8 >= 16 and rows8 <= block_rows:
        S = max(8, pl.cdiv(rows8, 16) * 8)

    rows_pad = pl.cdiv(rows8, S) * S
    grid = rows_pad // S

    # Pack x into feature-major dense slabs: (input_size, rows_pad, 128).
    xt = jnp.zeros((input_size, rows_pad * lanes), dtype).at[:, :B].set(x.T)
    xt = xt.reshape(input_size, rows_pad, lanes)

    # All weights/biases as one tiny SMEM-resident vector of scalars.
    params = jnp.concatenate(
        [w1.reshape(-1), b1.reshape(-1), w2.reshape(-1), b2.reshape(-1)]
    ).astype(jnp.float32)

    out_packed = pl.pallas_call(
        mlp_kernel,
        out_shape=jax.ShapeDtypeStruct((output_size, rows_pad, lanes), dtype),
        grid=(grid,),
        in_specs=[
            pl.BlockSpec(memory_space=pltpu.MemorySpace.SMEM),        # packed params
            pl.BlockSpec((input_size, S, lanes), lambda i: (0, i, 0)),  # x block (streamed)
        ],
        out_specs=pl.BlockSpec((output_size, S, lanes), lambda i: (0, i, 0)),
        compiler_params=pltpu.CompilerParams(
            dimension_semantics=("parallel",),        # megacore / both TCs on v7x
            vmem_limit_bytes=48 * 1024 * 1024,        # within v7x's 64 MiB; ample elsewhere
        ),
    )(params, xt)

    # Unpack: padded batch columns computed garbage and are sliced away here.
    return out_packed.reshape(output_size, rows_pad * lanes)[:, :B].T


def init_params(key):
    """PyTorch nn.Linear default init: U[-1/sqrt(fan_in), 1/sqrt(fan_in)].

    Layout: weight (out_features, in_features), bias (out_features,).
    """
    k1, k2, k3, k4 = jax.random.split(key, 4)
    bound1 = 1.0 / jnp.sqrt(jnp.float32(input_size))
    bound2 = 1.0 / jnp.sqrt(jnp.float32(hidden_size))
    w1 = jax.random.uniform(k1, (hidden_size, input_size), jnp.float32, -bound1, bound1)
    b1 = jax.random.uniform(k2, (hidden_size,), jnp.float32, -bound1, bound1)
    w2 = jax.random.uniform(k3, (output_size, hidden_size), jnp.float32, -bound2, bound2)
    b2 = jax.random.uniform(k4, (output_size,), jnp.float32, -bound2, bound2)
    return w1, b1, w2, b2


if __name__ == "__main__":
    key = jax.random.PRNGKey(0)
    kx, kp = jax.random.split(key)

    batch = 8
    x = jax.random.normal(kx, (batch, input_size), jnp.float32)
    w1, b1, w2, b2 = init_params(kp)

    out = mlp_forward(x, w1, b1, w2, b2)
    out = jax.block_until_ready(out)

    # Reference in plain JAX (PyTorch semantics: y = x @ W.T + b).
    h_ref = jax.nn.sigmoid(x @ w1.T + b1)
    ref = h_ref @ w2.T + b2
    assert out.shape == (batch, output_size)
    assert jnp.allclose(out, ref, atol=2e-3, rtol=2e-3), "mismatch vs JAX reference"

    print("KERNEL_OK")
</pallas_src>

<mosaic_0001>
module attributes {stable_mosaic.version = 11 : i64} {
  func.func @mlp_kernel(%arg0: i32, %arg1: memref<22xf32, #tpu.memory_space<smem>>, %arg2: memref<2x8x128xf32, #tpu.memory_space<vmem>>, %arg3: memref<2x8x128xf32, #tpu.memory_space<vmem>>) attributes {dimension_semantics = [#tpu.dimension_semantics<parallel>], iteration_bounds = array<i64: 1>, scalar_prefetch = 0 : i64, scratch_operands = 0 : i64, tpu.core_type = #tpu.core_type<tc>, window_params = [{transform_indices = @transform_0, window_bounds = array<i64: 22>}, {transform_indices = @transform_1, window_bounds = array<i64: 2, 8, 128>}, {transform_indices = @transform_2, window_bounds = array<i64: 2, 8, 128>}]} {
    %c0 = arith.constant 0 : index
    %c0_0 = arith.constant 0 : index
    %c0_1 = arith.constant 0 : index
    %0 = vector.load %arg2[%c0, %c0_0, %c0_1] : memref<2x8x128xf32, #tpu.memory_space<vmem>>, vector<1x8x128xf32>
    %1 = vector.shape_cast %0 : vector<1x8x128xf32> to vector<8x128xf32>
    %c1 = arith.constant 1 : index
    %c0_2 = arith.constant 0 : index
    %c0_3 = arith.constant 0 : index
    %2 = vector.load %arg2[%c1, %c0_2, %c0_3] : memref<2x8x128xf32, #tpu.memory_space<vmem>>, vector<1x8x128xf32>
    %3 = vector.shape_cast %2 : vector<1x8x128xf32> to vector<8x128xf32>
    %c0_4 = arith.constant 0 : index
    %4 = memref.load %arg1[%c0_4] : memref<22xf32, #tpu.memory_space<smem>>
    %5 = vector.broadcast %4 : f32 to vector<8x128xf32>
    %6 = arith.mulf %1, %5 : vector<8x128xf32>
    %c1_5 = arith.constant 1 : index
    %7 = memref.load %arg1[%c1_5] : memref<22xf32, #tpu.memory_space<smem>>
    %8 = vector.broadcast %7 : f32 to vector<8x128xf32>
    %9 = arith.mulf %3, %8 : vector<8x128xf32>
    %10 = arith.addf %6, %9 : vector<8x128xf32>
    %c8 = arith.constant 8 : index
    %11 = memref.load %arg1[%c8] : memref<22xf32, #tpu.memory_space<smem>>
    %12 = vector.broadcast %11 : f32 to vector<8x128xf32>
    %13 = arith.addf %10, %12 : vector<8x128xf32>
    %cst = arith.constant 5.000000e-01 : f32
    %14 = vector.broadcast %cst : f32 to vector<8x128xf32>
    %15 = arith.mulf %14, %13 : vector<8x128xf32>
    %16 = math.tanh %15 : vector<8x128xf32>
    %cst_6 = arith.constant 1.000000e+00 : f32
    %17 = vector.broadcast %cst_6 : f32 to vector<8x128xf32>
    %18 = arith.addf %16, %17 : vector<8x128xf32>
    %cst_7 = arith.constant 5.000000e-01 : f32
    %19 = vector.broadcast %cst_7 : f32 to vector<8x128xf32>
    %20 = arith.mulf %19, %18 : vector<8x128xf32>
    %c2 = arith.constant 2 : index
    %21 = memref.load %arg1[%c2] : memref<22xf32, #tpu.memory_space<smem>>
    %22 = vector.broadcast %21 : f32 to vector<8x128xf32>
    %23 = arith.mulf %1, %22 : vector<8x128xf32>
    %c3 = arith.constant 3 : index
    %24 = memref.load %arg1[%c3] : memref<22xf32, #tpu.memory_space<smem>>
    %25 = vector.broadcast %24 : f32 to vector<8x128xf32>
    %26 = arith.mulf %3, %25 : vector<8x128xf32>
    %27 = arith.addf %23, %26 : vector<8x128xf32>
    %c9 = arith.constant 9 : index
    %28 = memref.load %arg1[%c9] : memref<22xf32, #tpu.memory_space<smem>>
    %29 = vector.broadcast %28 : f32 to vector<8x128xf32>
    %30 = arith.addf %27, %29 : vector<8x128xf32>
    %cst_8 = arith.constant 5.000000e-01 : f32
    %31 = vector.broadcast %cst_8 : f32 to vector<8x128xf32>
    %32 = arith.mulf %31, %30 : vector<8x128xf32>
    %33 = math.tanh %32 : vector<8x128xf32>
    %cst_9 = arith.constant 1.000000e+00 : f32
    %34 = vector.broadcast %cst_9 : f32 to vector<8x128xf32>
    %35 = arith.addf %33, %34 : vector<8x128xf32>
    %cst_10 = arith.constant 5.000000e-01 : f32
    %36 = vector.broadcast %cst_10 : f32 to vector<8x128xf32>
    %37 = arith.mulf %36, %35 : vector<8x128xf32>
    %c4 = arith.constant 4 : index
    %38 = memref.load %arg1[%c4] : memref<22xf32, #tpu.memory_space<smem>>
    %39 = vector.broadcast %38 : f32 to vector<8x128xf32>
    %40 = arith.mulf %1, %39 : vector<8x128xf32>
    %c5 = arith.constant 5 : index
    %41 = memref.load %arg1[%c5] : memref<22xf32, #tpu.memory_space<smem>>
    %42 = vector.broadcast %41 : f32 to vector<8x128xf32>
    %43 = arith.mulf %3, %42 : vector<8x128xf32>
    %44 = arith.addf %40, %43 : vector<8x128xf32>
    %c10 = arith.constant 10 : index
    %45 = memref.load %arg1[%c10] : memref<22xf32, #tpu.memory_space<smem>>
    %46 = vector.broadcast %45 : f32 to vector<8x128xf32>
    %47 = arith.addf %44, %46 : vector<8x128xf32>
    %cst_11 = arith.constant 5.000000e-01 : f32
    %48 = vector.broadcast %cst_11 : f32 to vector<8x128xf32>
    %49 = arith.mulf %48, %47 : vector<8x128xf32>
    %50 = math.tanh %49 : vector<8x128xf32>
    %cst_12 = arith.constant 1.000000e+00 : f32
    %51 = vector.broadcast %cst_12 : f32 to vector<8x128xf32>
    %52 = arith.addf %50, %51 : vector<8x128xf32>
    %cst_13 = arith.constant 5.000000e-01 : f32
    %53 = vector.broadcast %cst_13 : f32 to vector<8x128xf32>
    %54 = arith.mulf %53, %52 : vector<8x128xf32>
    %c6 = arith.constant 6 : index
    %55 = memref.load %arg1[%c6] : memref<22xf32, #tpu.memory_space<smem>>
    %56 = vector.broadcast %55 : f32 to vector<8x128xf32>
    %57 = arith.mulf %1, %56 : vector<8x128xf32>
    %c7 = arith.constant 7 : index
    %58 = memref.load %arg1[%c7] : memref<22xf32, #tpu.memory_space<smem>>
    %59 = vector.broadcast %58 : f32 to vector<8x128xf32>
    %60 = arith.mulf %3, %59 : vector<8x128xf32>
    %61 = arith.addf %57, %60 : vector<8x128xf32>
    %c11 = arith.constant 11 : index
    %62 = memref.load %arg1[%c11] : memref<22xf32, #tpu.memory_space<smem>>
    %63 = vector.broadcast %62 : f32 to vector<8x128xf32>
    %64 = arith.addf %61, %63 : vector<8x128xf32>
    %cst_14 = arith.constant 5.000000e-01 : f32
    %65 = vector.broadcast %cst_14 : f32 to vector<8x128xf32>
    %66 = arith.mulf %65, %64 : vector<8x128xf32>
    %67 = math.tanh %66 : vector<8x128xf32>
    %cst_15 = arith.constant 1.000000e+00 : f32
    %68 = vector.broadcast %cst_15 : f32 to vector<8x128xf32>
    %69 = arith.addf %67, %68 : vector<8x128xf32>
    %cst_16 = arith.constant 5.000000e-01 : f32
    %70 = vector.broadcast %cst_16 : f32 to vector<8x128xf32>
    %71 = arith.mulf %70, %69 : vector<8x128xf32>
    %c12 = arith.constant 12 : index
    %72 = memref.load %arg1[%c12] : memref<22xf32, #tpu.memory_space<smem>>
    %73 = vector.broadcast %72 : f32 to vector<8x128xf32>
    %74 = arith.mulf %20, %73 : vector<8x128xf32>
    %c13 = arith.constant 13 : index
    %75 = memref.load %arg1[%c13] : memref<22xf32, #tpu.memory_space<smem>>
    %76 = vector.broadcast %75 : f32 to vector<8x128xf32>
    %77 = arith.mulf %37, %76 : vector<8x128xf32>
    %78 = arith.addf %74, %77 : vector<8x128xf32>
    %c14 = arith.constant 14 : index
    %79 = memref.load %arg1[%c14] : memref<22xf32, #tpu.memory_space<smem>>
    %80 = vector.broadcast %79 : f32 to vector<8x128xf32>
    %81 = arith.mulf %54, %80 : vector<8x128xf32>
    %82 = arith.addf %78, %81 : vector<8x128xf32>
    %c15 = arith.constant 15 : index
    %83 = memref.load %arg1[%c15] : memref<22xf32, #tpu.memory_space<smem>>
    %84 = vector.broadcast %83 : f32 to vector<8x128xf32>
    %85 = arith.mulf %71, %84 : vector<8x128xf32>
    %86 = arith.addf %82, %85 : vector<8x128xf32>
    %c20 = arith.constant 20 : index
    %87 = memref.load %arg1[%c20] : memref<22xf32, #tpu.memory_space<smem>>
    %88 = vector.broadcast %87 : f32 to vector<8x128xf32>
    %89 = arith.addf %86, %88 : vector<8x128xf32>
    %c0_17 = arith.constant 0 : index
    %c0_18 = arith.constant 0 : index
    %c0_19 = arith.constant 0 : index
    %90 = vector.load %arg3[%c0_17, %c0_18, %c0_19] : memref<2x8x128xf32, #tpu.memory_space<vmem>>, vector<1x8x128xf32>
    %91 = vector.shape_cast %90 : vector<1x8x128xf32> to vector<8x128xf32>
    %92 = vector.shape_cast %89 : vector<8x128xf32> to vector<1x8x128xf32>
    tpu.vector_store %arg3[%c0_17, %c0_18, %c0_19], %92 {strides = array<i32>} : memref<2x8x128xf32, #tpu.memory_space<vmem>>, vector<1x8x128xf32>,
    %c16 = arith.constant 16 : index
    %93 = memref.load %arg1[%c16] : memref<22xf32, #tpu.memory_space<smem>>
    %94 = vector.broadcast %93 : f32 to vector<8x128xf32>
    %95 = arith.mulf %20, %94 : vector<8x128xf32>
    %c17 = arith.constant 17 : index
    %96 = memref.load %arg1[%c17] : memref<22xf32, #tpu.memory_space<smem>>
    %97 = vector.broadcast %96 : f32 to vector<8x128xf32>
    %98 = arith.mulf %37, %97 : vector<8x128xf32>
    %99 = arith.addf %95, %98 : vector<8x128xf32>
    %c18 = arith.constant 18 : index
    %100 = memref.load %arg1[%c18] : memref<22xf32, #tpu.memory_space<smem>>
    %101 = vector.broadcast %100 : f32 to vector<8x128xf32>
    %102 = arith.mulf %54, %101 : vector<8x128xf32>
    %103 = arith.addf %99, %102 : vector<8x128xf32>
    %c19 = arith.constant 19 : index
    %104 = memref.load %arg1[%c19] : memref<22xf32, #tpu.memory_space<smem>>
    %105 = vector.broadcast %104 : f32 to vector<8x128xf32>
    %106 = arith.mulf %71, %105 : vector<8x128xf32>
    %107 = arith.addf %103, %106 : vector<8x128xf32>
    %c21 = arith.constant 21 : index
    %108 = memref.load %arg1[%c21] : memref<22xf32, #tpu.memory_space<smem>>
    %109 = vector.broadcast %108 : f32 to vector<8x128xf32>
    %110 = arith.addf %107, %109 : vector<8x128xf32>
    %c1_20 = arith.constant 1 : index
    %c0_21 = arith.constant 0 : index
    %c0_22 = arith.constant 0 : index
    %111 = vector.load %arg3[%c1_20, %c0_21, %c0_22] : memref<2x8x128xf32, #tpu.memory_space<vmem>>, vector<1x8x128xf32>
    %112 = vector.shape_cast %111 : vector<1x8x128xf32> to vector<8x128xf32>
    %113 = vector.shape_cast %110 : vector<8x128xf32> to vector<1x8x128xf32>
    tpu.vector_store %arg3[%c1_20, %c0_21, %c0_22], %113 {strides = array<i32>} : memref<2x8x128xf32, #tpu.memory_space<vmem>>, vector<1x8x128xf32>,
    return
  }
  func.func @transform_0(%arg0: i32) -> i32 {
    %c0_i32 = arith.constant 0 : i32
    %c0_i32_0 = arith.constant 0 : i32
    return %c0_i32 : i32
  }
  func.func @transform_1(%arg0: i32) -> (i32, i32, i32) {
    %c0_i32 = arith.constant 0 : i32
    %c0_i32_0 = arith.constant 0 : i32
    %c0_i32_1 = arith.constant 0 : i32
    return %c0_i32, %arg0, %c0_i32_0 : i32, i32, i32
  }
  func.func @transform_2(%arg0: i32) -> (i32, i32, i32) {
    %c0_i32 = arith.constant 0 : i32
    %c0_i32_0 = arith.constant 0 : i32
    %c0_i32_1 = arith.constant 0 : i32
    return %c0_i32, %arg0, %c0_i32_0 : i32, i32, i32
  }
}

</mosaic_0001>

<bundles_post_ra>
// kernel: mlp_forward.1
= control target key start
LH: loop header
LB: loop body
LE: loop exit
PB: predicated region body
PF: predicated region fallthrough
CT: control target
= control target key end

     0   :  { %7 = vsyncpa [#allocation3], 0  ;;  %s222_s0 = inlined_call_operand.vmem [shape: f32[22], index: 0, kind: input, shape index: {}]   ;;  %s223_s1 = inlined_call_operand.vmem [shape: f32[2,8,128], index: 1, kind: input, shape index: {}]   ;;  %s224_s2 = inlined_call_operand.vmem [shape: f32[2,8,128], index: 2, kind: output, shape index: {}]  }
   0x1   :  { %s14_s11 = sshll.u32 %s222_s0, 4  ;;  %s15_s11 = int_to_ptr.vmem [resolvable:$true] %s14_s11 }
   0x2   :  { %s159_s12 = scalar_lea.vmem %s15_s11, 16  ;;  %p164_p1 = scmp.lt.s32.totalorder %s15_s11, %s15_s11 }
   0x3   :  { %p160_p0 = scmp.ne.s32.totalorder %s15_s11, %s159_s12  ;;  %p165_p2 = scmp.lt.s32.totalorder %s159_s12, %s159_s12 }
   0x5   :  { %p166_p3 = por %p165_p2, %p164_p1 }
   0x7   :  { %p167_p4 = pnand %p166_p3, %p160_p0 }
   0x9   :  { %170 = shalt.err (!%p167_p4)
}
   0xa   :  { %s173_s13 = smov [#allocation2]  }
   0xb   :  { %17 = dma.vmem_to_smem %s15_s11, 16, %s173_s13, [#allocation3]  }
   0xc   :  { %171 = dma.done.wait [#allocation3], 16  }
   0xd   :  { %172 = vsyncadd [#allocation3], 4294967280 }
   0xe   :  { %23 = sfence }
   0xf   :  { %s27_s14 = sld [smem:[#allocation2]]  ;;  %s128_s15 = sld [smem:[#allocation2 + $0x1]]  ;;  %v24_v0 = vld [vmem:[%s223_s1] sm:$0xff]  ;;  %v127_v1 = vld [vmem:[%s223_s1 + $0x8] sm:$0xff] }
  0x10   :  { %s129_s16 = sld [smem:[#allocation2 + $0x8]]  ;;  %s130_s17 = sld [smem:[#allocation2 + $0x2]] }
  0x11   :  { %s131_s18 = sld [smem:[#allocation2 + $0x3]]  ;;  %s192_s19 = sld [smem:[#allocation2 + $0x9]] }
  0x12   :  { %s133_s0 = sld [smem:[#allocation2 + $0x4]]  ;;  %s134_s20 = sld [smem:[#allocation2 + $0x5]] }
  0x13   :  { %s200_s25 = sld [smem:[#allocation2 + $0xa]]  ;;  %s136_s26 = sld [smem:[#allocation2 + $0x6]] }
  0x14   :  { %s137_s27 = sld [smem:[#allocation2 + $0x7]]  ;;  %s202_s28 = sld [smem:[#allocation2 + $0xb]] }
  0x15   :  { %v28_v2 = vstv %s27_s14  ;;  %v31_v3 = vstv %s128_s15  ;;  %s139_s1 = sld [smem:[#allocation2 + $0xc]]  ;;  %s144_s29 = sld [smem:[#allocation2 + $0x10]] }
  0x16   :  { %v29_v4 = vmul.f32 %v28_v2, %v24_v0  ;;  %v32_v5 = vmul.f32 %v127_v1, %v31_v3  ;;  %v42_v6 = vstv %s130_s17  ;;  %v35_v7 = vstv %s129_s16  ;;  %s140_s30 = sld [smem:[#allocation2 + $0xd]]  ;;  %s207_s3 = sld [smem:[#allocation2 + $0xe]] }
  0x17   :  { %v43_v8 = vmul.f32 %v42_v6, %v24_v0  ;;  %v45_v9 = vstv %s131_s18  ;;  %v49_v10 = vstv %s192_s19  ;;  %s145_s4 = sld [smem:[#allocation2 + $0x11]]  ;;  %s146_s5 = sld [smem:[#allocation2 + $0x12]] }
  0x18   :  { %v33_v11 = vadd.f32 %v32_v5, %v29_v4  ;;  %v46_v12 = vmul.f32 %v127_v1, %v45_v9  ;;  %v56_v13 = vstv %s133_s0  ;;  %v59_v14 = vstv %s134_s20  ;;  %s209_s6 = sld [smem:[#allocation2 + $0xf]]  ;;  %s211_s7 = sld [smem:[#allocation2 + $0x13]] }
  0x19   :  { %v57_v15 = vmul.f32 %v56_v13, %v24_v0  ;;  %v60_v16 = vmul.f32 %v127_v1, %v59_v14  ;;  %v63_v17 = vstv %s200_s25  ;;  %v70_v18 = vstv %s136_s26  ;;  %s143_s8 = sld [smem:[#allocation2 + $0x14]]  ;;  %s148_s9 = sld [smem:[#allocation2 + $0x15]] }
  0x1a   :  { %v36_v19 = vadd.f32 %v35_v7, %v33_v11  ;;  %v47_v20 = vadd.f32 %v46_v12, %v43_v8  ;;  %v71_v21 = vmul.f32 %v70_v18, %v24_v0  ;;  %v73_v22 = vstv %s137_s27 }
  0x1b   :  { %v61_v23 = vadd.f32 %v60_v16, %v57_v15  ;;  %v74_v24 = vmul.f32 %v127_v1, %v73_v22  ;;  %v77_v27 = vstv %s202_s28  ;;  %v84_v37 = vstv %s139_s1 }
  0x1c   :  { %v37_v25 = vmul.f32 0.5, %v36_v19  ;;  %v50_v26 = vadd.f32 %v49_v10, %v47_v20  ;;  %v103_v38 = vstv %s144_s29  ;;  %v87_v43 = vstv %s140_s30 }
  0x1d   :  { %v64_v28 = vadd.f32 %v63_v17, %v61_v23  ;;  %v75_v29 = vadd.f32 %v74_v24, %v71_v21  ;;  %v91_v44 = vstv %s207_s3  ;;  %v106_v45 = vstv %s145_s4 }
  0x1e   :  { %151 = vtanh.f32 %v37_v25  ;;  %v51_v30 = vmul.f32 0.5, %v50_v26  ;;  %v110_v50 = vstv %s146_s5  ;;  %v95_v54 = vstv %s209_s6 }
  0x1f   :  { %v65_v31 = vmul.f32 0.5, %v64_v28  ;;  %v78_v32 = vadd.f32 %v77_v27, %v75_v29  ;;  %v114_v56 = vstv %s211_s7  ;;  %v99_v2 = vstv %s143_s8 }
  0x20   :  { %153 = vtanh.f32 %v51_v30  ;;  %v118_v3 = vstv %s148_s9 }
  0x21   :  { %155 = vtanh.f32 %v65_v31  ;;  %v79_v33 = vmul.f32 0.5, %v78_v32 }
  0x23   :  { %157 = vtanh.f32 %v79_v33 }
  0x28   :  { %v152_v34 = vpop.eup %151 }
  0x29   :  { %v39_v35 = vadd.f32 1.0, %v152_v34 }
  0x2a   :  { %v154_v36 = vpop.eup %153 }
  0x2b   :  { %v156_v39 = vpop.eup %155  ;;  %v40_v40 = vmul.f32 0.5, %v39_v35  ;;  %v53_v41 = vadd.f32 1.0, %v154_v36 }
  0x2c   :  { %v67_v42 = vadd.f32 1.0, %v156_v39 }
  0x2d   :  { %v158_v46 = vpop.eup %157  ;;  %v54_v47 = vmul.f32 0.5, %v53_v41  ;;  %v85_v48 = vmul.f32 %v84_v37, %v40_v40  ;;  %v104_v49 = vmul.f32 %v103_v38, %v40_v40 }
  0x2e   :  { %v68_v51 = vmul.f32 0.5, %v67_v42  ;;  %v81_v52 = vadd.f32 1.0, %v158_v46 }
  0x2f   :  { %v88_v53 = vmul.f32 %v87_v43, %v54_v47  ;;  %v107_v55 = vmul.f32 %v106_v45, %v54_v47 }
  0x30   :  { %v82_v57 = vmul.f32 0.5, %v81_v52  ;;  %v92_v58 = vmul.f32 %v91_v44, %v68_v51  ;;  %v111_v59 = vmul.f32 %v110_v50, %v68_v51 }
  0x31   :  { %v89_v60 = vadd.f32 %v88_v53, %v85_v48  ;;  %v108_v61 = vadd.f32 %v107_v55, %v104_v49 }
  0x32   :  { %v96_v62 = vmul.f32 %v95_v54, %v82_v57  ;;  %v115_v63 = vmul.f32 %v114_v56, %v82_v57 }
  0x33   :  { %v93_v0 = vadd.f32 %v92_v58, %v89_v60  ;;  %v112_v1 = vadd.f32 %v111_v59, %v108_v61 }
  0x35   :  { %v97_v4 = vadd.f32 %v96_v62, %v93_v0  ;;  %v116_v5 = vadd.f32 %v115_v63, %v112_v1 }
  0x37   :  { %v100_v6 = vadd.f32 %v99_v2, %v97_v4  ;;  %v119_v7 = vadd.f32 %v118_v3, %v116_v5 }
  0x39   :  { %101 = vst [vmem:[%s224_s2] sm:$0xff] %v100_v6  ;;  %149 = vst [vmem:[%s224_s2 + $0x8] sm:$0xff] %v119_v7 }
  0x3a   :  { %126 = vsyncpa [#allocation3], 1 }

</bundles_post_ra>
